<compile_context>
chip_gen: v7x
topology: tpu7x:2x2x1
jax: 0.10.0
libtpu: 0.0.40
codegen_flags: <defaults>
</compile_context>

<pallas_src>
import jax
import jax.numpy as jnp
from jax.experimental import pallas as pl
from jax.experimental.pallas import tpu as pltpu


def _matmul_kernel(x_ref, w_ref, o_ref):
    # Pure MXU tile: (TM, D) bf16 @ (D, TN) bf16 -> (TM, TN) f32.
    o_ref[...] = jnp.dot(x_ref[...], w_ref[...], preferred_element_type=jnp.float32)


def _round_up(v, m):
    return (v + m - 1) // m * m


def _balanced_tile(total, cap, align):
    """Largest aligned tile <= cap whose tiles are balanced over `total`."""
    cap = max(align, _round_up(min(cap, total), align))
    n_tiles = pl.cdiv(total, cap)
    return _round_up(pl.cdiv(total, n_tiles), align)


def dist_linear_forward(x, weight_v, weight_g, outdim=None, *, tm=512, tn=512,
                        vmem_budget_bytes=40 * 1024 * 1024):
    """distLinear forward. x: (N, D); weight_v: (C, D); weight_g: (C, 1)."""
    n, d = x.shape
    c = weight_v.shape[0]
    if outdim is None:
        outdim = c
    # NOTE: scale is chosen from `outdim`; callers passing outdim != C diverge
    # from the class count silently (matches previous behavior).
    scale = 2.0 if outdim <= 200 else 10.0

    # ---- hoisted prep (runs once in XLA, not per tile) ----------------------
    # Rows: x_n = scale * x / (||x|| + 1e-5), single cast to bf16 for the MXU.
    x32 = x.astype(jnp.float32)
    x_norm = jnp.sqrt(jnp.sum(x32 * x32, axis=1, keepdims=True))
    x_n = (x32 * (scale / (x_norm + 1e-5))).astype(jnp.bfloat16)          # (N, D)

    # Weights: coef = g / ||v||_row folded in f32 (one rounding), then (D, C)
    # so the kernel contracts a plain (TM,D)@(D,TN) with no transpose.
    wv32 = weight_v.astype(jnp.float32)
    w_norm = jnp.sqrt(jnp.sum(wv32 * wv32, axis=1, keepdims=True))        # (C, 1)
    coef = weight_g.astype(jnp.float32) / w_norm
    w_t = (wv32 * coef).T.astype(jnp.bfloat16)                            # (D, C)

    # ---- tile selection (balanced, aligned, VMEM-budgeted) -------------------
    tm_eff = _balanced_tile(n, tm, 8)
    tn_eff = _balanced_tile(c, tn, 128)

    def _tile_bytes(tm_, tn_):
        # 2-deep pipelining for both inputs and the output.
        return 2 * (tm_ * d * 2) + 2 * (d * tn_ * 2) + 2 * (tm_ * tn_ * 4)

    while _tile_bytes(tm_eff, tn_eff) > vmem_budget_bytes and (tn_eff > 128 or tm_eff > 8):
        if tn_eff > 128:
            tn_eff = _round_up(tn_eff // 2, 128)
        else:
            tm_eff = _round_up(tm_eff // 2, 8)
    # TODO(synk): for extremely large feature dims even minimal (8,128) tiles can
    # exceed the budget; that case needs a K grid axis with an f32 accumulator.

    n_pad = _round_up(n, tm_eff)
    c_pad = _round_up(c, tn_eff)

    # Zero padding is exact: padded rows are zero (already-normalized x), padded
    # classes are zero columns -> zero scores, sliced off below. No NaNs.
    x_p = jnp.pad(x_n, ((0, n_pad - n), (0, 0)))
    w_p = jnp.pad(w_t, ((0, 0), (0, c_pad - c)))

    gi = n_pad // tm_eff
    gj = c_pad // tn_eff

    # ---- grid ordering: keep the operand that would be re-streamed most ------
    # Order A (i outer, j inner): x read once, weights re-streamed gi times.
    # Order B (j outer, i inner): weights read once, x re-streamed gj times.
    bytes_a = n_pad * d * 2 + gi * (c_pad * d * 2)
    bytes_b = c_pad * d * 2 + gj * (n_pad * d * 2)
    if bytes_a <= bytes_b:
        grid = (gi, gj)
        x_map = lambda i, j: (i, 0)
        w_map = lambda i, j: (0, j)
        o_map = lambda i, j: (i, j)
    else:
        grid = (gj, gi)
        x_map = lambda j, i: (i, 0)
        w_map = lambda j, i: (0, j)
        o_map = lambda j, i: (i, j)

    cost = pl.CostEstimate(
        flops=2 * n_pad * c_pad * d,
        transcendentals=0,
        bytes_accessed=min(bytes_a, bytes_b) + n_pad * c_pad * 4,
    )
    vmem_limit = min(
        max(int(_tile_bytes(tm_eff, tn_eff) * 1.5), 32 * 1024 * 1024),
        64 * 1024 * 1024,
    )

    out = pl.pallas_call(
        _matmul_kernel,
        out_shape=jax.ShapeDtypeStruct((n_pad, c_pad), jnp.float32),
        grid=grid,
        in_specs=[
            pl.BlockSpec((tm_eff, d), x_map),     # pre-normalized x rows, bf16
            pl.BlockSpec((d, tn_eff), w_map),     # pre-scaled, pre-transposed W
        ],
        out_specs=pl.BlockSpec((tm_eff, tn_eff), o_map),
        compiler_params=pltpu.CompilerParams(
            dimension_semantics=("parallel", "parallel"),
            vmem_limit_bytes=vmem_limit,
        ),
        cost_estimate=cost,
    )(x_p, w_p)

    return out[:n, :c]


def reference_forward(x, weight_v, weight_g, outdim):
    scale = 2.0 if outdim <= 200 else 10.0
    x_norm = jnp.linalg.norm(x, axis=1, keepdims=True)
    x_n = x / (x_norm + 1e-5)
    w_norm = jnp.linalg.norm(weight_v, axis=1, keepdims=True)
    w = weight_g * weight_v / w_norm
    return scale * (x_n @ w.T)


if __name__ == "__main__":
    key = jax.random.PRNGKey(0)
    k_x, k_w = jax.random.split(key)

    batch, indim, outdim = 8, 32, 16

    # Deterministic parameter init (synthetic; mirrors nn.Linear-style scale).
    bound = 1.0 / jnp.sqrt(jnp.float32(indim))
    weight_v = jax.random.uniform(
        k_w, (outdim, indim), dtype=jnp.float32, minval=-bound, maxval=bound
    )
    # WeightNorm init sets g = ||v||_row so the effective weight equals v.
    weight_g = jnp.linalg.norm(weight_v, axis=1, keepdims=True)

    x = jax.random.normal(k_x, (batch, indim), dtype=jnp.float32)

    out = dist_linear_forward(x, weight_v, weight_g, outdim)
    out = jax.block_until_ready(out)

    ref = reference_forward(x, weight_v, weight_g, outdim)
    assert out.shape == (batch, outdim)
    # bf16 MXU inputs (f32 accumulation): tolerance relaxed vs the f32 reference.
    assert jnp.allclose(out, ref, atol=2e-2, rtol=2e-2), (
        float(jnp.max(jnp.abs(out - ref)))
    )

    print("KERNEL_OK")
</pallas_src>

<mosaic_0001>
module attributes {stable_mosaic.version = 11 : i64} {
  func.func @_matmul_kernel(%arg0: i32, %arg1: i32, %arg2: memref<8x32xbf16, #tpu.memory_space<vmem>>, %arg3: memref<32x128xbf16, #tpu.memory_space<vmem>>, %arg4: memref<8x128xf32, #tpu.memory_space<vmem>>) attributes {dimension_semantics = [#tpu.dimension_semantics<parallel>, #tpu.dimension_semantics<parallel>], iteration_bounds = array<i64: 1, 1>, scalar_prefetch = 0 : i64, scratch_operands = 0 : i64, tpu.core_type = #tpu.core_type<tc>, window_params = [{transform_indices = @transform_0, window_bounds = array<i64: 8, 32>}, {transform_indices = @transform_1, window_bounds = array<i64: 32, 128>}, {transform_indices = @transform_2, window_bounds = array<i64: 8, 128>}]} {
    %c0 = arith.constant 0 : index
    %c0_0 = arith.constant 0 : index
    %0 = vector.load %arg2[%c0, %c0_0] : memref<8x32xbf16, #tpu.memory_space<vmem>>, vector<8x32xbf16>
    %c0_1 = arith.constant 0 : index
    %c0_2 = arith.constant 0 : index
    %1 = vector.load %arg3[%c0_1, %c0_2] : memref<32x128xbf16, #tpu.memory_space<vmem>>, vector<32x128xbf16>
    %cst = arith.constant dense<0.000000e+00> : vector<8x128xf32>
    %2 = tpu.matmul %0, %1, %cst {dimension_numbers = #tpu.dot_dimension_numbers<[1], [0], [0], [1], [0, 0, 1, 1], [], []>} : vector<8x32xbf16>, vector<32x128xbf16>, vector<8x128xf32> -> vector<8x128xf32>
    %c0_3 = arith.constant 0 : index
    %c0_4 = arith.constant 0 : index
    %3 = vector.load %arg4[%c0_3, %c0_4] : memref<8x128xf32, #tpu.memory_space<vmem>>, vector<8x128xf32>
    tpu.vector_store %arg4[%c0_3, %c0_4], %2 {strides = array<i32>} : memref<8x128xf32, #tpu.memory_space<vmem>>, vector<8x128xf32>,
    return
  }
  func.func @transform_0(%arg0: i32, %arg1: i32) -> (i32, i32) {
    %c0_i32 = arith.constant 0 : i32
    %c0_i32_0 = arith.constant 0 : i32
    return %arg0, %c0_i32 : i32, i32
  }
  func.func @transform_1(%arg0: i32, %arg1: i32) -> (i32, i32) {
    %c0_i32 = arith.constant 0 : i32
    %c0_i32_0 = arith.constant 0 : i32
    return %c0_i32, %arg1 : i32, i32
  }
  func.func @transform_2(%arg0: i32, %arg1: i32) -> (i32, i32) {
    %c0_i32 = arith.constant 0 : i32
    return %arg0, %arg1 : i32, i32
  }
}

</mosaic_0001>

<bundles_post_ra>
// kernel: tpu_custom_call.1
= control target key start
LH: loop header
LB: loop body
LE: loop exit
PB: predicated region body
PF: predicated region fallthrough
CT: control target
= control target key end

     0   :  { %7 = vsyncpa [#allocation3], 0  ;;  %s277_s0 = inlined_call_operand.hbm [shape: bf16[8,32], index: 0, kind: input, shape index: {}]   ;;  %s278_s1 = inlined_call_operand.hbm [shape: bf16[32,128], index: 1, kind: input, shape index: {}]   ;;  %s279_s2 = inlined_call_operand.hbm [shape: f32[8,128], index: 2, kind: output, shape index: {}]  }
   0x1   :  { %8 = vsyncpa [#allocation6], 0 }
   0x2   :  { %9 = vsyncpa [#allocation4], 0  ;;  %s212_s9 = smov [#allocation2]   ;;  %s213_s11 = smov [#allocation5]  }
   0x3   :  { %s16_s10 = sshll.u32 %s212_s9, 4  ;;  %s25_s12 = sshll.u32 %s213_s11, 4  ;;  %s17_s10 = int_to_ptr.vmem [resolvable:$true] %s16_s10  ;;  %s234_s12 = int_to_ptr.vmem [resolvable:$true] %s25_s12 }
   0x4   :  { %s140_s15 = scalar_lea.hbm %s277_s0, 64 }
   0x5   :  { %p141_p0 = scmp.ne.s32.totalorder %s277_s0, %s140_s15  ;;  %p144_p1 = scmp.lt.u32.totalorder %s140_s15, %s277_s0 }
   0x7   :  { %p146_p2 = pnand %p144_p1, %p141_p0 }
   0x9   :  { %149 = shalt.err (!%p146_p2)
}
   0xa   :  { %s150_s20 = scalar_lea.vmem %s17_s10, 64  ;;  %p155_p4 = scmp.lt.s32.totalorder %s17_s10, %s17_s10 }
   0xb   :  { %p151_p3 = scmp.ne.s32.totalorder %s17_s10, %s150_s20  ;;  %p156_p5 = scmp.lt.s32.totalorder %s150_s20, %s150_s20 }
   0xd   :  { %p157_p6 = por %p156_p5, %p155_p4 }
   0xf   :  { %p158_p7 = pnand %p157_p6, %p151_p3 }
  0x11   :  { %161 = shalt.err (!%p158_p7)
}
  0x12   :  { %19 = dma.hbm_to_vmem [thread:$0]  %s277_s0, 64, %s17_s10, [#allocation3]  }
  0x13   :  { %s162_s25 = scalar_lea.hbm %s278_s1, 256 }
  0x14   :  { %p163_p8 = scmp.ne.s32.totalorder %s278_s1, %s162_s25  ;;  %p166_p9 = scmp.lt.u32.totalorder %s162_s25, %s278_s1 }
  0x16   :  { %p168_p10 = pnand %p166_p9, %p163_p8 }
  0x18   :  { %171 = shalt.err (!%p168_p10)
}
  0x19   :  { %s172_s30 = scalar_lea.vmem %s234_s12, 256  ;;  %p177_p12 = scmp.lt.s32.totalorder %s234_s12, %s234_s12 }
  0x1a   :  { %p173_p11 = scmp.ne.s32.totalorder %s234_s12, %s172_s30  ;;  %p178_p13 = scmp.lt.s32.totalorder %s172_s30, %s172_s30 }
  0x1c   :  { %p179_p0 = por %p178_p13, %p177_p12 }
  0x1e   :  { %p180_p1 = pnand %p179_p0, %p173_p11 }
  0x20   :  { %183 = shalt.err (!%p180_p1)
}
  0x21   :  { %s214_s0 = smov 64   ;;  %s215_s3 = smov 4  }
  0x22   :  { %31 = dma.hbm_to_vmem [thread:$0]  %s278_s1, 256, %s234_s12, [#allocation6], %s214_s0, %s214_s0, %s215_s3  }
  0x23   :  { %206 = dma.done.wait [#allocation3], 64  }
  0x24   :  { %207 = vsyncadd [#allocation3], 4294967232 }
  0x25   :  { %208 = dma.done.wait [#allocation6], 256  }
  0x26   :  { %209 = vsyncadd [#allocation6], 4294967040  ;;  %v216_v0 = vmov 0.0   ;;  %vm217_vm0 = vmmov 0   ;;  %v138_v1 = vld [vmem:[#allocation5] sm:$0xff]   ;;  %v139_v2 = vld [vmem:[#allocation5 + $0x8] sm:$0xff]  }
  0x27   :  { %123 = vmatprep.subr.bf16.mxu0 %v216_v0  ;;  %127 = vmatprep.mubr.msk.bf16.mxu0 %vm217_vm0, %v216_v0  ;;  %v39_v3 = vld [vmem:[#allocation2] sm:$0xf]  ;;  %vm56_vm1 = vcmask 261120   ;;  %s218_s6 = smov [#allocation7]  }
  0x28   :  { %124 = vmatpush3.bf16.msra.mxu0 %v138_v1  ;;  %s107_s7 = sshll.u32 %s218_s6, 4  ;;  %s108_s7 = int_to_ptr.vmem [resolvable:$true] %s107_s7 }
  0x29   :  { %125 = vmatprep.subr.bf16.mxu0 %v216_v0  ;;  %s184_s1 = scalar_lea.vmem %s108_s7, 128  ;;  %p189_p3 = scmp.lt.s32.totalorder %s108_s7, %s108_s7 }
  0x2a   :  { %p185_p2 = scmp.ne.s32.totalorder %s108_s7, %s184_s1  ;;  %p190_p4 = scmp.lt.s32.totalorder %s184_s1, %s184_s1 }
  0x2c   :  { %126 = vmatpush3.bf16.msra.mxu0 %v139_v2  ;;  %p191_p5 = por %p190_p4, %p189_p3 }
  0x2e   :  { %p192_p6 = pnand %p191_p5, %p185_p2 }
  0x2f   :  { %128 = vmatmul.mubr.msk.bf16.vlgmr.msra.gmra.mrb[0].mxu0 %vm56_vm1, %v39_v3 }
 0x102   :  { %v94_v4 = vpop.f32.mrb[0].mxu0 }
 0x103   :  { %100 = vst [vmem:[#allocation7] sm:$0xff] %v94_v4  ;;  %v129_v5 = vpop.f32.mrb[1].mxu0 }
 0x104   :  { %v97_v6 = vpop.f32.mrb[2].mxu0 }
 0x105   :  { %195 = shalt.err (!%p192_p6)
}
 0x106   :  { %s196_s10 = scalar_lea.hbm %s279_s2, 128 }
 0x107   :  { %p197_p7 = scmp.ne.s32.totalorder %s279_s2, %s196_s10  ;;  %p200_p8 = scmp.lt.u32.totalorder %s196_s10, %s279_s2 }
 0x109   :  { %p202_p9 = pnand %p200_p8, %p197_p7 }
 0x10b   :  { %205 = shalt.err (!%p202_p9)
}
 0x10c   :  { %110 = dma.vmem_to_hbm [thread:$0]  %s108_s7, 128, %s279_s2, [#allocation4]   ;;  %v130_v7 = vpop.f32.mrb[3].mxu0 }
 0x10d   :  { %210 = dma.done.wait [#allocation4], 128  }
 0x10e   :  { %211 = vsyncadd [#allocation4], 4294967168 }
 0x10f   :  { %114 = vsyncpa [#allocation3], 1 }
 0x110   :  { %115 = vsyncpa [#allocation6], 1 }
 0x111   :  { %116 = vsyncpa [#allocation4], 1 }

</bundles_post_ra>
